<compile_context>
chip_gen: v7x
topology: tpu7x:2x2x1
jax: 0.10.0
libtpu: 0.0.40
codegen_flags: <defaults>
</compile_context>

<pallas_src>
import math

import jax
import jax.numpy as jnp
from jax.experimental import pallas as pl
from jax.experimental.pallas import tpu as pltpu


def _spatial_dropout_kernel(mask_ref, x_ref, o_ref):
    # mask_ref: (1, L) scaled per-channel keep mask for this batch (period C along L).
    # x_ref / o_ref: (TT, L) tile.  Pure VPU broadcast-multiply.
    o_ref[...] = x_ref[...] * mask_ref[...]


def _row_multiple(itemsize: int) -> int:
    # Sublane packing multiple for the dtype (f32: 8, bf16: 16, int8/fp8: 32).
    if itemsize >= 4:
        return 8
    if itemsize == 2:
        return 16
    return 32


def _pick_row_tile(rows: int, row_bytes: int, row_mult: int) -> int:
    # Largest row tile keeping one block <= ~2 MiB (in + out, double buffered, stays
    # well under the default scoped-VMEM limit on all of v5e/v6e/v7x).
    target = max(row_mult, (2 * 1024 * 1024) // max(1, row_bytes))
    tt = min(rows, target)
    if tt < rows:
        tt = max(row_mult, (tt // row_mult) * row_mult)
    return tt


def spatial_dropout_1d(x, drop_rate: float, key, *, deterministic: bool = False):
    """SpatialDropout1D forward.  x: (B, T, C) -> (B, T, C), same dtype.

    Matches the torch module: per-(batch, channel) Bernoulli drop, constant over T,
    inverted-dropout scaling 1/(1-p).  deterministic=True -> identity (eval mode).
    """
    if deterministic or drop_rate == 0.0:
        return x
    if drop_rate >= 1.0:
        return jnp.zeros_like(x)

    B, T, C = x.shape
    dtype = x.dtype
    itemsize = jnp.dtype(dtype).itemsize
    scale = 1.0 / (1.0 - drop_rate)

    # Per-(batch, channel) keep mask, pre-scaled for inverted dropout; constant over T.
    keep = jax.random.bernoulli(key, p=1.0 - drop_rate, shape=(B, C))
    mask = keep.astype(dtype) * jnp.asarray(scale, dtype=dtype)

    # Lane-dense repack: fold G consecutive time steps into the lane axis so the block
    # last dim is a multiple of 128 even for small C.  Mask repeats with period C.
    g = 128 // math.gcd(C, 128)
    G = g if (g > 1 and T % g == 0) else 1

    rows = T // G
    L = G * C
    x_v = x.reshape(B, rows, L)                       # contiguous view, free
    mask_v = jnp.tile(mask, (1, G)).reshape(B, 1, L)  # (B, 1, G*C), tiny

    row_mult = _row_multiple(itemsize)
    tt = _pick_row_tile(rows, L * itemsize, row_mult)
    grid = (B, pl.cdiv(rows, tt))

    out = pl.pallas_call(
        _spatial_dropout_kernel,
        out_shape=jax.ShapeDtypeStruct((B, rows, L), dtype),
        grid_spec=pltpu.PrefetchScalarGridSpec(
            num_scalar_prefetch=0,
            grid=grid,
            in_specs=[
                pl.BlockSpec((None, 1, L), lambda b, t: (b, 0, 0)),   # mask: per batch
                pl.BlockSpec((None, tt, L), lambda b, t: (b, t, 0)),  # x tile
            ],
            out_specs=pl.BlockSpec((None, tt, L), lambda b, t: (b, t, 0)),
        ),
        compiler_params=pltpu.CompilerParams(
            dimension_semantics=("parallel", "parallel"),
        ),
    )(mask_v, x_v)
    return out.reshape(B, T, C)


if __name__ == "__main__":
    drop_rate = 0.25
    scale = 1.0 / (1.0 - drop_rate)

    root = jax.random.PRNGKey(0)
    x_key, mask_key, x2_key, mask2_key = jax.random.split(root, 4)

    # Main case: C=8 -> folds G=16 time steps, lane dim = 128 (lane-dense path).
    B, T, C = 2, 16, 8
    x = jax.random.normal(x_key, (B, T, C), dtype=jnp.float32)
    out = jax.block_until_ready(spatial_dropout_1d(x, drop_rate, mask_key))

    keep_ref = jax.random.bernoulli(mask_key, p=1.0 - drop_rate, shape=(B, C))
    expected = x * keep_ref.astype(x.dtype)[:, None, :] * jnp.float32(scale)

    assert out.shape == x.shape and out.dtype == x.dtype
    # Every element is either zeroed or scaled by exactly 1/(1-p).
    assert bool(jnp.all(jnp.logical_or(jnp.isclose(out, 0.0),
                                       jnp.isclose(out, x * scale, rtol=1e-5))))
    # Each (batch, channel) column is dropped or kept as a whole (constant over T).
    kept = jnp.abs(out) > 0.0
    assert bool(jnp.all(jnp.all(kept, axis=1) == jnp.any(kept, axis=1)))
    # Exact match against a direct recomputation with the same mask key.
    assert bool(jnp.allclose(out, expected, rtol=1e-6, atol=1e-6))

    # Fallback path: T not divisible by the fold factor -> plain (TT, C) blocks.
    B2, T2, C2 = 2, 10, 8
    x2 = jax.random.normal(x2_key, (B2, T2, C2), dtype=jnp.float32)
    out2 = jax.block_until_ready(spatial_dropout_1d(x2, drop_rate, mask2_key))
    keep2 = jax.random.bernoulli(mask2_key, p=1.0 - drop_rate, shape=(B2, C2))
    expected2 = x2 * keep2.astype(x2.dtype)[:, None, :] * jnp.float32(scale)
    assert bool(jnp.allclose(out2, expected2, rtol=1e-6, atol=1e-6))

    # Eval-mode / edge-case paths.
    assert jnp.array_equal(
        spatial_dropout_1d(x, drop_rate, mask_key, deterministic=True), x)
    assert bool(jnp.all(spatial_dropout_1d(x, 1.0, mask_key) == 0.0))

    print("KERNEL_OK")
</pallas_src>

<mosaic_0001>
module attributes {stable_mosaic.version = 11 : i64} {
  func.func @_spatial_dropout_kernel(%arg0: i32, %arg1: i32, %arg2: memref<1x1x128xf32, #tpu.memory_space<vmem>>, %arg3: memref<1x1x128xf32, #tpu.memory_space<vmem>>, %arg4: memref<1x1x128xf32, #tpu.memory_space<vmem>>) attributes {dimension_semantics = [#tpu.dimension_semantics<parallel>, #tpu.dimension_semantics<parallel>], iteration_bounds = array<i64: 2, 1>, scalar_prefetch = 0 : i64, scratch_operands = 0 : i64, tpu.core_type = #tpu.core_type<tc>, window_params = [{transform_indices = @transform_0, window_bounds = array<i64: 1, 1, 128>}, {transform_indices = @transform_1, window_bounds = array<i64: 1, 1, 128>}, {transform_indices = @transform_2, window_bounds = array<i64: 1, 1, 128>}]} {
    %c0 = arith.constant 0 : index
    %c0_0 = arith.constant 0 : index
    %c0_1 = arith.constant 0 : index
    %0 = vector.load %arg3[%c0, %c0_0, %c0_1] : memref<1x1x128xf32, #tpu.memory_space<vmem>>, vector<1x1x128xf32>
    %1 = vector.shape_cast %0 : vector<1x1x128xf32> to vector<1x128xf32>
    %c0_2 = arith.constant 0 : index
    %c0_3 = arith.constant 0 : index
    %c0_4 = arith.constant 0 : index
    %2 = vector.load %arg2[%c0_2, %c0_3, %c0_4] : memref<1x1x128xf32, #tpu.memory_space<vmem>>, vector<1x1x128xf32>
    %3 = vector.shape_cast %2 : vector<1x1x128xf32> to vector<1x128xf32>
    %4 = arith.mulf %1, %3 : vector<1x128xf32>
    %c0_5 = arith.constant 0 : index
    %c0_6 = arith.constant 0 : index
    %c0_7 = arith.constant 0 : index
    %5 = vector.load %arg4[%c0_5, %c0_6, %c0_7] : memref<1x1x128xf32, #tpu.memory_space<vmem>>, vector<1x1x128xf32>
    %6 = vector.shape_cast %5 : vector<1x1x128xf32> to vector<1x128xf32>
    %7 = vector.shape_cast %4 : vector<1x128xf32> to vector<1x1x128xf32>
    tpu.vector_store %arg4[%c0_5, %c0_6, %c0_7], %7 {strides = array<i32>} : memref<1x1x128xf32, #tpu.memory_space<vmem>>, vector<1x1x128xf32>,
    return
  }
  func.func @transform_0(%arg0: i32, %arg1: i32) -> (i32, i32, i32) {
    %c0_i32 = arith.constant 0 : i32
    %c0_i32_0 = arith.constant 0 : i32
    %c0_i32_1 = arith.constant 0 : i32
    return %arg0, %c0_i32, %c0_i32_0 : i32, i32, i32
  }
  func.func @transform_1(%arg0: i32, %arg1: i32) -> (i32, i32, i32) {
    %c0_i32 = arith.constant 0 : i32
    %c0_i32_0 = arith.constant 0 : i32
    return %arg0, %arg1, %c0_i32 : i32, i32, i32
  }
  func.func @transform_2(%arg0: i32, %arg1: i32) -> (i32, i32, i32) {
    %c0_i32 = arith.constant 0 : i32
    %c0_i32_0 = arith.constant 0 : i32
    return %arg0, %arg1, %c0_i32 : i32, i32, i32
  }
}

</mosaic_0001>

<bundles_post_ra>
// kernel: tpu_custom_call.1
= control target key start
LH: loop header
LB: loop body
LE: loop exit
PB: predicated region body
PF: predicated region fallthrough
CT: control target
= control target key end

     0   :  { %7 = vsyncpa [#allocation3], 0  ;;  %s676_s0 = inlined_call_operand.hbm [shape: f32[2,1,128], index: 0, kind: input, shape index: {}]   ;;  %s677_s1 = inlined_call_operand.vmem [shape: f32[2,1,128], index: 1, kind: input, shape index: {}]   ;;  %s678_s2 = inlined_call_operand.hbm [shape: f32[2,1,128], index: 2, kind: output, shape index: {}]  }
   0x1   :  { %9 = vsyncpa [#allocation3 + $0x1], 0 }
   0x2   :  { %10 = vsyncpa [#allocation4], 0 }
   0x3   :  { %12 = vsyncpa [#allocation4 + $0x1], 0  ;;  %s498_s9 = smov 0   ;;  %s500_s10 = smov 0  }
   0x4   :  { %s502_s11 = smov 0   ;;  %s504_s12 = smov 0  }
   0x5   :  { %s506_s13 = smov 0   ;;  %s508_s14 = smov 0  }
   0x6 LB: > { %s296_s15 = sadd.s32 4294967295, %s479_s14   ;;  %s297_s16 = sadd.s32 4294967294, %s479_s14   ;;  %s479_s14 = sphi %s508_s14, %s18_s14   ;;  %s475_s13 = sphi %s506_s13, %s694_s13   ;;  %s471_s12 = sphi %s504_s12, %s693_s12   ;;  %s467_s11 = sphi %s502_s11, %s692_s11   ;;  %s463_s10 = sphi %s500_s10, %s691_s10   ;;  %s459_s9 = sphi %s498_s9, %s690_s9  }
   0x7   : > { %s30_s17 = sadd.s32 1, %s475_s13  ;;  %s37_s18 = sadd.s32 1, %s467_s11 }
   0x8   : > { %p32_p0 = scmp.ge.s32.totalorder %s30_s17, 2  ;;  %p44_p1 = scmp.ne.s32.totalorder %s467_s11, %s463_s10 }
   0x9   : > { %p45_p2 = scmp.eq.s32.totalorder %s479_s14, 0  ;;  %p50_p3 = scmp.ne.s32.totalorder %s463_s10, %s459_s9 }
   0xa   : > { %s696_s17 = smov (%p32_p0, %s30_s17), 0  ;;  %p51_p5 = scmp.eq.s32.totalorder %s296_s15, 0 }
   0xb   : > { %p539_p4 = por %p45_p2, %p44_p1  ;;  %s34_s20 = ssub.s32 %s475_s13, %s696_s17 }
   0xc   : > { %p104_p6 = scmp.eq.s32.totalorder %s296_s15, 1  ;;  %p35_p7 = scmp.eq.s32.totalorder %s34_s20, 0 }
   0xd   : > { %p545_p8 = por %p51_p5, %p50_p3  ;;  %p110_p10 = scmp.eq.s32.totalorder %s297_s16, 1 }
   0xe   : > { %p549_p9 = por %p104_p6, %p44_p1  ;;  %p317_p13 = scmp.lt.s32.totalorder %s479_s14, 2 }
   0xf   : > { %s554_s23 = scalar_select %p35_p7, %s467_s11, %s37_s18  }
  0x10   : > { %s682_s22 = scalar_select %p549_p9, 1, 0 }
  0x11   : > { %p556_p11 = por %p110_p10, %p50_p3  ;;  %s130_s25 = sand.u32 1, %s467_s11  }
  0x12   : > { %s300_s26 = sshll.u32 %s475_s13, 4  ;;  %s133_s27 = scalar_lea.vmem [#allocation2], %s130_s25 }
  0x13   : > { %s683_s24 = scalar_select %p556_p11, 1, 0 }
  0x14   : > { %s140_s28 = sshll.u32 %s133_s27, 4  ;;  %s567_s3 = scalar_lea.hbm %s676_s0, %s300_s26  ;;  %s569_s28 = int_to_ptr.vmem [resolvable:$true] %s140_s28 }
  0x15   : > { %p573_p0 = pnand %p317_p13, %p539_p4  ;;  %s131_s5 = scalar_lea.sflag [#allocation3], %s130_s25 }
  0x16   : > { %s367_s6 = scalar_lea.hbm %s567_s3, 16  ;;  %s372_s15 = scalar_lea.hbm %s676_s0, 32 }
  0x17   : > { %p368_p3 = scmp.ne.s32.totalorder %s567_s3, %s367_s6  ;;  %p369_p5 = pneg %p573_p0 }
  0x18   : > { %p373_p4 = scmp.lt.u32.totalorder %s567_s3, %s676_s0  ;;  %p374_p10 = scmp.lt.u32.totalorder %s372_s15, %s367_s6 }
  0x19   : > { %p370_p6 = pnand %p369_p5, %p368_p3  ;;  %p376_p12 = scmp.lt.u32.totalorder %s367_s6, %s567_s3 }
  0x1a   : > { %p375_p13 = por %p374_p10, %p373_p4 }
  0x1b   : > { %p371_p7 = pneg %p370_p6 }
  0x1c   : > { %p377_p1 = por %p376_p12, %p375_p13 }
  0x1e   : > { %p378_p2 = pnand %p377_p1, %p371_p7 }
  0x20   : > { %381 = shalt.err (!%p378_p2)
}
  0x21   : > { %s382_s19 = scalar_lea.vmem %s569_s28, 16  ;;  %s481_s20 = smov [#allocation2]  }
  0x22   : > { %p383_p3 = scmp.ne.s32.totalorder %s569_s28, %s382_s19  ;;  %s387_s25 = sshll.u32 %s481_s20, 4  ;;  %s388_s25 = int_to_ptr.vmem [resolvable:$false] %s387_s25 }
  0x23   : > { %s389_s26 = scalar_lea.vmem %s388_s25, 32  ;;  %p390_p9 = scmp.lt.s32.totalorder %s569_s28, %s388_s25 }
  0x24   : > { %p385_p6 = pnand %p383_p3, %p369_p5  ;;  %p391_p4 = scmp.lt.s32.totalorder %s389_s26, %s382_s19 }
  0x26   : > { %p386_p11 = pneg %p385_p6  ;;  %p392_p10 = por %p391_p4, %p390_p9 }
  0x28   : > { %p393_p12 = pnand %p392_p10, %p386_p11 }
  0x2a   : > { %396 = shalt.err (!%p393_p12)
}
  0x2b   : > { %312 = dma.hbm_to_vmem [thread:$0]  (!%p573_p0), %s567_s3, 16, %s569_s28, %s131_s5  }
  0x2c   : > { %p685_p1 = scmp.lt.s32.totalorder %s479_s14, 3  ;;  %p686_p2 = scmp.ge.s32.totalorder %s479_s14, 1 }
  0x2e   : > { %p155_p5 = pnand %p686_p2, %p685_p1 }
  0x2f   : > { %s609_s27 = sand.u32 (!%p155_p5), 1, %s463_s10  }
  0x30   : > { %158 = sbr.rel (%p155_p5) target bundleno = 84 (0x54), region = 28  ;;  %s161_s29 = scalar_lea.sflag (!%p155_p5), [#allocation3], %s609_s27 }
  0x31   : > { %s163_s30 = scalar_lea.vmem (!%p155_p5), [#allocation2], %s609_s27 }
  0x37   : > { %450 = dma.done.wait (%p545_p8), %s161_s29, 16  }
  0x38   : > { %452 = vsyncadd (%p545_p8), %s161_s29, 4294967280  ;;  %p188_p9 = scmp.lt.s32.totalorder %s471_s12, 1  ;;  %s187_s6 = scalar_lea.vmem [#allocation5], %s609_s27  ;;  %v195_v1 = vld [vmem:[%s163_s30] sm:$0x1] }
  0x39   : > { %s212_s7 = sshll.u32 %s187_s6, 4  ;;  %s302_s8 = sshll.u32 %s471_s12, 4  ;;  %s624_s7 = int_to_ptr.vmem [resolvable:$true] %s212_s7 }
  0x3a   : > { %s189_s28 = scalar_select %p188_p9, %s471_s12, 1 }
  0x3b   : > { %s629_s16 = scalar_lea.hbm %s678_s2, %s302_s8  ;;  %s199_s18 = scalar_lea.sflag [#allocation4], %s609_s27 }
  0x3c   : > { %s193_s5 = scalar_lea.vmem %s677_s1, %s189_s28  ;;  %s397_s19 = scalar_lea.vmem %s624_s7, 16 }
  0x3d   : > { %v194_v0 = vld [vmem:[%s193_s5] sm:$0x1]  ;;  %p398_p8 = scmp.ne.s32.totalorder %s624_s7, %s397_s19  ;;  %p687_p11 = scmp.ne.s32.totalorder %s682_s22, 0 }
  0x3e   : > { %v196_v2 = vmul.f32 %v195_v1, %v194_v0  ;;  %s482_s12 = smov [#allocation5]  }
  0x3f   : > { %p399_p0 = pnand %p398_p8, %p687_p11  ;;  %s401_s20 = sshll.u32 %s482_s12, 4  ;;  %s402_s20 = int_to_ptr.vmem [resolvable:$false] %s401_s20 }
  0x40   : > { %197 = vst [vmem:[%s187_s6] sm:$0x1] %v196_v2  ;;  %s403_s25 = scalar_lea.vmem %s402_s20, 32  ;;  %p404_p13 = scmp.lt.s32.totalorder %s624_s7, %s402_s20 }
  0x41   : > { %p400_p7 = pneg %p399_p0  ;;  %p405_p3 = scmp.lt.s32.totalorder %s403_s25, %s397_s19 }
  0x43   : > { %p406_p6 = por %p405_p3, %p404_p13 }
  0x45   : > { %p407_p4 = pnand %p406_p6, %p400_p7 }
  0x47   : > { %410 = shalt.err (!%p407_p4)
}
  0x48   : > { %s411_s26 = scalar_lea.hbm %s629_s16, 16  ;;  %s415_s30 = scalar_lea.hbm %s678_s2, 32 }
  0x49   : > { %p412_p10 = scmp.ne.s32.totalorder %s629_s16, %s411_s26  ;;  %p416_p2 = scmp.lt.u32.totalorder %s629_s16, %s678_s2 }
  0x4a   : > { %p417_p5 = scmp.lt.u32.totalorder %s415_s30, %s411_s26  ;;  %p419_p8 = scmp.lt.u32.totalorder %s411_s26, %s629_s16 }
  0x4b   : > { %p413_p12 = pnand %p412_p10, %p687_p11 }
  0x4c   : > { %p418_p9 = por %p417_p5, %p416_p2 }
  0x4d   : > { %p414_p1 = pneg %p413_p12 }
  0x4e   : > { %p420_p0 = por %p419_p8, %p418_p9 }
  0x50   : > { %p421_p7 = pnand %p420_p0, %p414_p1 }
  0x52   : > { %424 = shalt.err (!%p421_p7)
}
  0x53   : > { %307 = dma.vmem_to_hbm [thread:$0]  (%p687_p11), %s624_s7, 16, %s629_s16, %s199_s18  }
  0x54 PF: > { %s224_s4 = sand.u32 1, %s459_s9   ;;  %p688_p13 = scmp.ne.s32.totalorder %s683_s24, 0 }
  0x55   : > { %p689_p3 = scmp.ge.s32.totalorder %s479_s14, 2  ;;  %s225_s5 = scalar_lea.sflag [#allocation4], %s224_s4 }
  0x57   : > { %p314_p6 = pnand %p689_p3, %p688_p13 }
  0x59   : > { %454 = dma.done.wait (!%p314_p6), %s225_s5, 16  }
  0x5a   : > { %456 = vsyncadd (!%p314_p6), %s225_s5, 4294967280  ;;  %s18_s14 = sadd.s32 1, %s479_s14   ;;  %s690_s9 = smov %s463_s10 }
  0x5b   : > { %p15_p4 = scmp.ge.s32.totalorder %s18_s14, 4   ;;  %s691_s10 = smov %s467_s11 }
  0x5c   : > { %s692_s11 = smov %s554_s23  ;;  %s693_s12 = smov %s475_s13 }
  0x5d   : > { %s694_s13 = smov %s696_s17  ;;  %17 = sbr.rel (!%p15_p4) target bundleno = 6 (0x6), region = 76 }
  0x64   :  { %229 = vsyncpa [#allocation3], 1 }
  0x65   :  { %231 = vsyncpa [#allocation3 + $0x1], 1 }
  0x66   :  { %232 = vsyncpa [#allocation4], 1 }
  0x67   :  { %234 = vsyncpa [#allocation4 + $0x1], 1 }

</bundles_post_ra>
